<compile_context>
chip_gen: v5e
topology: v5e:2x2
jax: 0.10.0
libtpu: 0.0.40
codegen_flags: <defaults>
</compile_context>

<pallas_src>
import numpy as np
import jax
import jax.numpy as jnp
from jax.experimental import pallas as pl
from jax.experimental.pallas import tpu as pltpu


def _round_up(x, m):
    return ((x + m - 1) // m) * m


def _ffc_kernel(x_ref, w1_ref, b1_ref, w2_ref, b2_ref, out_ref):
    """Fused 2-layer MLP with ReLU. x/w are bf16; accumulate + activate in f32."""
    x = x_ref[...]                                           # (TB, Vp) bf16
    # Layer 1: (TB, Vp) @ (Vp, Hp) -> f32, + bias, ReLU in f32.
    h = jnp.dot(x, w1_ref[...], preferred_element_type=jnp.float32) + b1_ref[...]
    h = jnp.maximum(h, 0.0)
    # Layer 2: feed MXU bf16 again, accumulate f32.
    o = jnp.dot(h.astype(jnp.bfloat16), w2_ref[...],
                preferred_element_type=jnp.float32) + b2_ref[...]
    o = jnp.maximum(o, 0.0)
    out_ref[...] = o.astype(out_ref.dtype)


def feed_forward_controller(x, packed, state):
    """x: (B, vector_length) f32. Returns (output (B, hidden_size) f32, state)."""
    w1p, b1p, w2p, b2p = packed["w1"], packed["b1"], packed["w2"], packed["b2"]
    V, H = packed["vector_length"], packed["hidden_size"]
    B = x.shape[0]
    Vp, Hp = w1p.shape

    # Batch tiling: pad to a sublane multiple (>=8); tile rows 128 at a time
    # when enough rows are stacked (multiple NTM timesteps / sequences).
    TB = 128 if B >= 128 else _round_up(max(B, 1), 8)
    Bp = _round_up(B, TB)

    # Zero-pad x into a lane/sublane-dense bf16 slab.
    xp = jnp.zeros((Bp, Vp), jnp.bfloat16).at[:B, :V].set(x.astype(jnp.bfloat16))

    out_padded = pl.pallas_call(
        _ffc_kernel,
        out_shape=jax.ShapeDtypeStruct((Bp, Hp), jnp.float32),
        grid=(Bp // TB,),
        in_specs=[
            pl.BlockSpec((TB, Vp), lambda i: (i, 0)),    # x row tile
            pl.BlockSpec((Vp, Hp), lambda i: (0, 0)),    # w1 resident
            pl.BlockSpec((1, Hp), lambda i: (0, 0)),     # b1 resident
            pl.BlockSpec((Hp, Hp), lambda i: (0, 0)),    # w2 resident
            pl.BlockSpec((1, Hp), lambda i: (0, 0)),     # b2 resident
        ],
        out_specs=pl.BlockSpec((TB, Hp), lambda i: (i, 0)),
        compiler_params=pltpu.CompilerParams(
            dimension_semantics=("parallel",),
            vmem_limit_bytes=64 * 1024 * 1024,
        ),
    )(xp, w1p, b1p, w2p, b2p)

    return out_padded[:B, :H], state


def init_params(key, vector_length, hidden_size):
    """f32 master params matching the PyTorch module's __init__.

    Weights: uniform(-stdev, stdev), stdev = 5/sqrt(vector_length + hidden_size).
    Biases:  PyTorch nn.Linear default uniform(-1/sqrt(fan_in), 1/sqrt(fan_in)).
    Weights are stored transposed: (in_features, out_features).
    """
    stdev = 5.0 / np.sqrt(vector_length + hidden_size)
    k1, k2, k3, k4 = jax.random.split(key, 4)
    w1 = jax.random.uniform(k1, (vector_length, hidden_size), jnp.float32,
                            minval=-stdev, maxval=stdev)
    w2 = jax.random.uniform(k2, (hidden_size, hidden_size), jnp.float32,
                            minval=-stdev, maxval=stdev)
    bb1 = 1.0 / np.sqrt(vector_length)
    bb2 = 1.0 / np.sqrt(hidden_size)
    b1 = jax.random.uniform(k3, (1, hidden_size), jnp.float32, minval=-bb1, maxval=bb1)
    b2 = jax.random.uniform(k4, (1, hidden_size), jnp.float32, minval=-bb2, maxval=bb2)
    return (w1, b1, w2, b2)


def pack_params(params):
    """Zero-pad feature dims to 128 multiples; weights in bf16, biases in f32."""
    w1, b1, w2, b2 = params
    V, H = w1.shape
    Vp, Hp = _round_up(V, 128), _round_up(H, 128)
    w1p = jnp.zeros((Vp, Hp), jnp.bfloat16).at[:V, :H].set(w1.astype(jnp.bfloat16))
    w2p = jnp.zeros((Hp, Hp), jnp.bfloat16).at[:H, :H].set(w2.astype(jnp.bfloat16))
    b1p = jnp.zeros((1, Hp), jnp.float32).at[:, :H].set(b1)
    b2p = jnp.zeros((1, Hp), jnp.float32).at[:, :H].set(b2)
    return dict(w1=w1p, b1=b1p, w2=w2p, b2=b2p,
                vector_length=V, hidden_size=H)


def get_initial_state():
    return (0, 0)


def _reference(x, params):
    w1, b1, w2, b2 = params
    h = jnp.maximum(x @ w1 + b1, 0.0)
    return jnp.maximum(h @ w2 + b2, 0.0)


if __name__ == "__main__":
    vector_length = 16
    hidden_size = 32
    batch = 2

    key = jax.random.PRNGKey(0)
    kx, kp = jax.random.split(key)
    x = jax.random.normal(kx, (batch, vector_length), jnp.float32)
    params = init_params(kp, vector_length, hidden_size)
    packed = pack_params(params)
    state = get_initial_state()

    out, new_state = feed_forward_controller(x, packed, state)
    out = jax.block_until_ready(out)

    # bf16 MXU operands -> loosened tolerance vs the f32 reference.
    ref = _reference(x, params)
    np.testing.assert_allclose(np.asarray(out), np.asarray(ref), rtol=2e-2, atol=2e-2)
    assert out.shape == (batch, hidden_size)
    assert new_state == state
    print("KERNEL_OK")
</pallas_src>

<mosaic_0001>
module attributes {stable_mosaic.version = 11 : i64} {
  func.func @_ffc_kernel(%arg0: i32, %arg1: memref<8x128xbf16, #tpu.memory_space<vmem>>, %arg2: memref<128x128xbf16, #tpu.memory_space<vmem>>, %arg3: memref<1x128xf32, #tpu.memory_space<vmem>>, %arg4: memref<128x128xbf16, #tpu.memory_space<vmem>>, %arg5: memref<1x128xf32, #tpu.memory_space<vmem>>, %arg6: memref<8x128xf32, #tpu.memory_space<vmem>>) attributes {dimension_semantics = [#tpu.dimension_semantics<parallel>], iteration_bounds = array<i64: 1>, scalar_prefetch = 0 : i64, scratch_operands = 0 : i64, tpu.core_type = #tpu.core_type<tc>, window_params = [{transform_indices = @transform_0, window_bounds = array<i64: 8, 128>}, {pipeline_mode = #tpu.pipeline_mode<synchronous>, transform_indices = @transform_1, window_bounds = array<i64: 128, 128>}, {pipeline_mode = #tpu.pipeline_mode<synchronous>, transform_indices = @transform_2, window_bounds = array<i64: 1, 128>}, {pipeline_mode = #tpu.pipeline_mode<synchronous>, transform_indices = @transform_3, window_bounds = array<i64: 128, 128>}, {pipeline_mode = #tpu.pipeline_mode<synchronous>, transform_indices = @transform_4, window_bounds = array<i64: 1, 128>}, {transform_indices = @transform_5, window_bounds = array<i64: 8, 128>}]} {
    %c0 = arith.constant 0 : index
    %c0_0 = arith.constant 0 : index
    %0 = vector.load %arg1[%c0, %c0_0] : memref<8x128xbf16, #tpu.memory_space<vmem>>, vector<8x128xbf16>
    %c0_1 = arith.constant 0 : index
    %c0_2 = arith.constant 0 : index
    %1 = vector.load %arg2[%c0_1, %c0_2] : memref<128x128xbf16, #tpu.memory_space<vmem>>, vector<128x128xbf16>
    %cst = arith.constant dense<0.000000e+00> : vector<8x128xf32>
    %2 = tpu.matmul %0, %1, %cst {dimension_numbers = #tpu.dot_dimension_numbers<[1], [0], [0], [1], [0, 0, 1, 1], [], []>} : vector<8x128xbf16>, vector<128x128xbf16>, vector<8x128xf32> -> vector<8x128xf32>
    %c0_3 = arith.constant 0 : index
    %c0_4 = arith.constant 0 : index
    %3 = vector.load %arg3[%c0_3, %c0_4] : memref<1x128xf32, #tpu.memory_space<vmem>>, vector<1x128xf32>
    %4 = vector.broadcast %3 : vector<1x128xf32> to vector<8x128xf32>
    %5 = arith.addf %2, %4 : vector<8x128xf32>
    %cst_5 = arith.constant 0.000000e+00 : f32
    %6 = vector.broadcast %cst_5 : f32 to vector<8x128xf32>
    %7 = arith.maximumf %5, %6 : vector<8x128xf32>
    %8 = arith.truncf %7 : vector<8x128xf32> to vector<8x128xbf16>
    %c0_6 = arith.constant 0 : index
    %c0_7 = arith.constant 0 : index
    %9 = vector.load %arg4[%c0_6, %c0_7] : memref<128x128xbf16, #tpu.memory_space<vmem>>, vector<128x128xbf16>
    %cst_8 = arith.constant dense<0.000000e+00> : vector<8x128xf32>
    %10 = tpu.matmul %8, %9, %cst_8 {dimension_numbers = #tpu.dot_dimension_numbers<[1], [0], [0], [1], [0, 0, 1, 1], [], []>} : vector<8x128xbf16>, vector<128x128xbf16>, vector<8x128xf32> -> vector<8x128xf32>
    %c0_9 = arith.constant 0 : index
    %c0_10 = arith.constant 0 : index
    %11 = vector.load %arg5[%c0_9, %c0_10] : memref<1x128xf32, #tpu.memory_space<vmem>>, vector<1x128xf32>
    %12 = vector.broadcast %11 : vector<1x128xf32> to vector<8x128xf32>
    %13 = arith.addf %10, %12 : vector<8x128xf32>
    %cst_11 = arith.constant 0.000000e+00 : f32
    %14 = vector.broadcast %cst_11 : f32 to vector<8x128xf32>
    %15 = arith.maximumf %13, %14 : vector<8x128xf32>
    %c0_12 = arith.constant 0 : index
    %c0_13 = arith.constant 0 : index
    %16 = vector.load %arg6[%c0_12, %c0_13] : memref<8x128xf32, #tpu.memory_space<vmem>>, vector<8x128xf32>
    tpu.vector_store %arg6[%c0_12, %c0_13], %15 {strides = array<i32>} : memref<8x128xf32, #tpu.memory_space<vmem>>, vector<8x128xf32>,
    return
  }
  func.func @transform_0(%arg0: i32) -> (i32, i32) {
    %c0_i32 = arith.constant 0 : i32
    %c0_i32_0 = arith.constant 0 : i32
    return %arg0, %c0_i32 : i32, i32
  }
  func.func @transform_1(%arg0: i32) -> (i32, i32) {
    %c0_i32 = arith.constant 0 : i32
    %c0_i32_0 = arith.constant 0 : i32
    %c0_i32_1 = arith.constant 0 : i32
    return %c0_i32, %c0_i32_0 : i32, i32
  }
  func.func @transform_2(%arg0: i32) -> (i32, i32) {
    %c0_i32 = arith.constant 0 : i32
    %c0_i32_0 = arith.constant 0 : i32
    %c0_i32_1 = arith.constant 0 : i32
    return %c0_i32, %c0_i32_0 : i32, i32
  }
  func.func @transform_3(%arg0: i32) -> (i32, i32) {
    %c0_i32 = arith.constant 0 : i32
    %c0_i32_0 = arith.constant 0 : i32
    %c0_i32_1 = arith.constant 0 : i32
    return %c0_i32, %c0_i32_0 : i32, i32
  }
  func.func @transform_4(%arg0: i32) -> (i32, i32) {
    %c0_i32 = arith.constant 0 : i32
    %c0_i32_0 = arith.constant 0 : i32
    %c0_i32_1 = arith.constant 0 : i32
    return %c0_i32, %c0_i32_0 : i32, i32
  }
  func.func @transform_5(%arg0: i32) -> (i32, i32) {
    %c0_i32 = arith.constant 0 : i32
    %c0_i32_0 = arith.constant 0 : i32
    return %arg0, %c0_i32 : i32, i32
  }
}

</mosaic_0001>

<bundles_post_ra>
// kernel: tpu_custom_call.1
= control target key start
LH: loop header
LB: loop body
LE: loop exit
PB: predicated region body
PF: predicated region fallthrough
CT: control target
= control target key end

     0   :  { %10 = vsyncpa [#allocation3], 0  ;;  %s495_s0 = inlined_call_operand.hbm [shape: bf16[8,128], index: 0, kind: input, shape index: {}]   ;;  %s496_s1 = inlined_call_operand.hbm [shape: bf16[128,128], index: 1, kind: input, shape index: {}]   ;;  %s497_s2 = inlined_call_operand.vmem [shape: f32[1,128], index: 2, kind: input, shape index: {}]   ;;  %s498_s3 = inlined_call_operand.hbm [shape: bf16[128,128], index: 3, kind: input, shape index: {}]   ;;  %s499_s4 = inlined_call_operand.vmem [shape: f32[1,128], index: 4, kind: input, shape index: {}]   ;;  %s500_s5 = inlined_call_operand.hbm [shape: f32[8,128], index: 5, kind: output, shape index: {}]  }
   0x1   :  { %11 = vsyncpa [#allocation6], 0  ;;  %s28_s20 = sshll.u32 %s496_s1, 4  ;;  %s29_s20 = int_to_ptr.hbm [resolvable:$true] %s28_s20 }
   0x2   :  { %12 = vsyncpa [#allocation4], 0  ;;  %s441_s21 = smov [#allocation5]   ;;  %s18_s25 = sshll.u32 %s495_s0, 4  ;;  %s19_s25 = int_to_ptr.hbm [resolvable:$true] %s18_s25 }
   0x3   :  { %s30_s22 = sshll.u32 %s441_s21, 4  ;;  %s442_s26 = smov 64   ;;  %s31_s22 = int_to_ptr.vmem [resolvable:$true] %s30_s22 }
   0x4   :  { %s443_s27 = smov 4   ;;  %s444_s28 = smov [#allocation2]  }
   0x5   :  { %36 = dma.hbm_to_vmem [thread:$0]  %s29_s20, 1024, %s31_s22, [#allocation6], %s442_s26, %s442_s26, %s443_s27  }
   0x6   :  { %s20_s29 = sshll.u32 %s444_s28, 4  ;;  %s43_s7 = sshll.u32 %s498_s3, 4  ;;  %s21_s29 = int_to_ptr.vmem [resolvable:$true] %s20_s29  ;;  %s44_s7 = int_to_ptr.hbm [resolvable:$true] %s43_s7 }
   0x7   :  { %23 = dma.hbm_to_vmem [thread:$0]  %s19_s25, 64, %s21_s29, [#allocation3]  }
   0x8   :  { %s445_s1 = smov [#allocation7]  }
   0x9   :  { %s45_s8 = sshll.u32 %s445_s1, 4  ;;  %s46_s8 = int_to_ptr.vmem [resolvable:$true] %s45_s8 }
   0xa   :  { %51 = dma.hbm_to_vmem [thread:$0]  %s44_s7, 1024, %s46_s8, [#allocation6], %s442_s26, %s442_s26, %s443_s27  }
   0xb   :  { %435 = dma.done.wait [#allocation3], 64  }
   0xc   :  { %436 = vsyncadd [#allocation3], 4294967232 }
   0xd   :  { %437 = dma.done.wait [#allocation6], 2048  }
   0xe   :  { %438 = vsyncadd [#allocation6], 4294965248  ;;  %v322_v0 = vld [vmem:[#allocation5 + $0x38] sm:$0xff]  ;;  %v321_v1 = vld [vmem:[#allocation5 + $0x30] sm:$0xff]  ;;  %s446_s11 = smov [#allocation8]   ;;  %s240_s15 = sshll.u32 %s500_s5, 4  ;;  %s241_s15 = int_to_ptr.hbm [resolvable:$true] %s240_s15 }
   0xf   :  { %135 = vmatpush.bf16.msra.mxu0 %v322_v0  ;;  %v330_v2 = vld [vmem:[#allocation7 + $0x38] sm:$0xff]  ;;  %v329_v3 = vld [vmem:[#allocation7 + $0x30] sm:$0xff]  ;;  %v320_v4 = vld [vmem:[#allocation5 + $0x28] sm:$0xff]  ;;  %s238_s12 = sshll.u32 %s446_s11, 4  ;;  %s239_s12 = int_to_ptr.vmem [resolvable:$true] %s238_s12 }
  0x10   :  { %218 = vmatpush.bf16.msra.mxu1 %v330_v2  ;;  %v328_v5 = vld [vmem:[#allocation7 + $0x28] sm:$0xff]  ;;  %v319_v6 = vld [vmem:[#allocation5 + $0x20] sm:$0xff]  ;;  %v318_v8 = vld [vmem:[#allocation5 + $0x18] sm:$0xff] }
  0x11   :  { %v327_v7 = vld [vmem:[#allocation7 + $0x20] sm:$0xff]  ;;  %v326_v9 = vld [vmem:[#allocation7 + $0x18] sm:$0xff]  ;;  %v317_v10 = vld [vmem:[#allocation5 + $0x10] sm:$0xff] }
  0x12   :  { %v325_v11 = vld [vmem:[#allocation7 + $0x10] sm:$0xff]  ;;  %v316_v12 = vld [vmem:[#allocation5 + $0x8] sm:$0xff]  ;;  %v315_v13 = vld [vmem:[#allocation5] sm:$0xff] }
  0x13   :  { %136 = vmatpush.bf16.msra.mxu0 %v321_v1  ;;  %v66_v14 = vld [vmem:[#allocation2] sm:$0xf]  ;;  %v324_v15 = vld [vmem:[#allocation7 + $0x8] sm:$0xff]  ;;  %v323_v16 = vld [vmem:[#allocation7] sm:$0xff] }
  0x14   :  { %219 = vmatpush.bf16.msra.mxu1 %v329_v3  ;;  %v337_v17 = vld [vmem:[%s497_s2] ss:$0 sm:$0xff] }
  0x15   :  { %v338_v23 = vld [vmem:[%s499_s4] ss:$0 sm:$0xff] }
  0x17   :  { %137 = vmatpush.bf16.msra.mxu0 %v320_v4 }
  0x18   :  { %220 = vmatpush.bf16.msra.mxu1 %v328_v5 }
  0x1b   :  { %138 = vmatpush.bf16.msra.mxu0 %v319_v6 }
  0x1c   :  { %221 = vmatpush.bf16.msra.mxu1 %v327_v7 }
  0x1f   :  { %139 = vmatpush.bf16.msra.mxu0 %v318_v8 }
  0x20   :  { %222 = vmatpush.bf16.msra.mxu1 %v326_v9 }
  0x23   :  { %140 = vmatpush.bf16.msra.mxu0 %v317_v10 }
  0x24   :  { %223 = vmatpush.bf16.msra.mxu1 %v325_v11 }
  0x27   :  { %141 = vmatpush.bf16.msra.mxu0 %v316_v12 }
  0x28   :  { %224 = vmatpush.bf16.msra.mxu1 %v324_v15 }
  0x2b   :  { %142 = vmatpush.bf16.msra.mxu0 %v315_v13 }
  0x2c   :  { %225 = vmatpush.bf16.msra.mxu1 %v323_v16 }
  0x2e   :  { %143 = vmatmul.bf16.vlgmr.msra.gmra.mxu0 %v66_v14 }
  0xab   :  { %v144_v18 = vpop.f32.mrf.mxu0 }
  0xac   :  { %v145_v19 = vadd.f32 %v337_v17, %v144_v18 }
  0xae   :  { %v148_v20 = vmax.f32 %v145_v19, 0.0 }
  0xb0   :  { %v149_v21 = vpack.c.bf16 %v148_v20, %v148_v20 }
  0xb2   :  { %226 = vmatmul.bf16.vlgmr.msra.gmra.mxu1 %v149_v21 }
  0xb3   :  { %v146_v22 = vpop.f32.mrf.mxu0 }
 0x12f   :  { %v227_v24 = vpop.f32.mrf.mxu1 }
 0x130   :  { %v228_v25 = vadd.f32 %v338_v23, %v227_v24 }
 0x132   :  { %v231_v26 = vmax.f32 %v228_v25, 0.0 }
 0x134   :  { %232 = vst [vmem:[#allocation8] sm:$0xff] %v231_v26 }
 0x135   :  { %243 = dma.vmem_to_hbm [thread:$0]  %s239_s12, 128, %s241_s15, [#allocation4]  }
 0x137   :  { %v229_v27 = vpop.f32.mrf.mxu1 }
 0x138   :  { %439 = dma.done.wait [#allocation4], 128  }
 0x139   :  { %440 = vsyncadd [#allocation4], 4294967168 }
 0x13a   :  { %248 = vsyncpa [#allocation3], 1 }
 0x13b   :  { %249 = vsyncpa [#allocation6], 1 }
 0x13c   :  { %250 = vsyncpa [#allocation4], 1 }

</bundles_post_ra>
